<compile_context>
chip_gen: v6e
topology: v6e:2x2x1
jax: 0.10.0
libtpu: 0.0.40
codegen_flags: <defaults>
</compile_context>

<pallas_src>
import functools
import math

import jax
import jax.numpy as jnp
from jax.experimental import pallas as pl
from jax.experimental.pallas import tpu as pltpu

_LANE = 128
_VMEM_LIMIT = 48 * 1024 * 1024  # fits v5e/v6e (128 MiB) and v7x (64 MiB) physical


def _largest_divisor(n, max_val, multiple):
    """Largest d <= max_val with n % d == 0 and d % multiple == 0, else None."""
    if max_val < multiple:
        return None
    d = (max_val // multiple) * multiple
    while d >= multiple:
        if n % d == 0:
            return d
        d -= multiple
    return None


def _pick_row_tile(n, max_tile=1024):
    # Keep >= 2 row blocks when possible so the "parallel" row axis can be
    # split across both TensorCores on v7x.
    cap = min(max_tile, n // 2) if n >= 16 else n
    d = _largest_divisor(n, cap, 8)
    return d if d is not None else n


def _pick_col_tile(n, max_tile=512):
    # Prefer a multiple of 256 (v6e/v7x MXU width), then 128 (v5e), then any
    # sublane multiple, then the full dim (always a legal block shape).
    for mult in (256, 128, 8):
        d = _largest_divisor(n, min(max_tile, n), mult)
        if d is not None:
            return d
    return n


def _pick_batch_tile(b, max_tile=256):
    d = _largest_divisor(b, min(max_tile, b), 8)
    return d if d is not None else b


# --------------------------------------------------------------------------
# Kernel 1: normalize, fold 1/sqrt(tau), positive logits, bf16 cast.
# --------------------------------------------------------------------------
def _normalize_kernel(z1_ref, z2_ref, zs_ref, pos_ref, *, inv_sqrt_tau, eps_sq):
    z1 = z1_ref[...].astype(jnp.float32)
    z2 = z2_ref[...].astype(jnp.float32)
    # torch F.normalize: x / max(||x||, eps) == x * rsqrt(max(||x||^2, eps^2))
    s1 = jax.lax.rsqrt(jnp.maximum(jnp.sum(z1 * z1, axis=-1, keepdims=True), eps_sq))
    s2 = jax.lax.rsqrt(jnp.maximum(jnp.sum(z2 * z2, axis=-1, keepdims=True), eps_sq))
    z1s = z1 * (s1 * inv_sqrt_tau)          # = normalized(z1) / sqrt(tau)
    z2s = z2 * (s2 * inv_sqrt_tau)
    # Single (2, tile_b, D) output block: halves become a contiguous (N, D)
    # array via a free reshape in the wrapper (no concat / extra HBM pass).
    zs_ref[0] = z1s.astype(zs_ref.dtype)
    zs_ref[1] = z2s.astype(zs_ref.dtype)
    # z1s . z2s == (z1n . z2n) / tau -> positive logit, in f32, pre-cast.
    pos_ref[...] = jnp.sum(z1s * z2s, axis=-1, keepdims=True)


# --------------------------------------------------------------------------
# Kernel 2: flash-style masked row-sum of exp(Gram / tau).
# --------------------------------------------------------------------------
def _neg_kernel(rows_ref, cols_ref, logneg_ref, acc_ref, *,
                tile_r, tile_c, acc_w):
    i = pl.program_id(0)
    j = pl.program_id(1)

    @pl.when(j == 0)
    def _init():
        acc_ref[...] = jnp.zeros_like(acc_ref)

    # bf16 x bf16 -> f32 MXU matmul, contracting the lane (feature) dim of
    # both operands (no transpose / relayout).  Operands already carry the
    # 1/sqrt(tau) scaling, so s = (z_r . z_c) / tau.
    s = jax.lax.dot_general(
        rows_ref[...], cols_ref[...],
        dimension_numbers=(((1,), (1,)), ((), ())),
        preferred_element_type=jnp.float32)           # (tile_r, tile_c) f32
    e = jnp.exp(s)

    def _accumulate(tile):
        # Lane-partial accumulation: only full-lane VPU adds in the hot loop;
        # the cross-lane (XLU) reduce happens once in the finalize.
        acc = acc_ref[...]
        for c in range(tile_c // acc_w):
            acc = acc + tile[:, c * acc_w:(c + 1) * acc_w]
        acc_ref[...] = acc

    r0 = i * tile_r
    c0 = j * tile_c
    on_diag = jnp.logical_and(r0 < c0 + tile_c, c0 < r0 + tile_r)

    @pl.when(on_diag)
    def _masked():
        # Exact diagonal removal (valid also for bf16-rounded rows): zero out
        # the i == j entries only in blocks intersecting the diagonal.
        rid = r0 + jax.lax.broadcasted_iota(jnp.int32, (tile_r, tile_c), 0)
        cid = c0 + jax.lax.broadcasted_iota(jnp.int32, (tile_r, tile_c), 1)
        _accumulate(jnp.where(rid == cid, 0.0, e))

    @pl.when(jnp.logical_not(on_diag))
    def _unmasked():
        _accumulate(e)

    @pl.when(j == pl.num_programs(1) - 1)
    def _finalize():
        logneg_ref[...] = jnp.log(jnp.sum(acc_ref[...], axis=-1, keepdims=True))


# --------------------------------------------------------------------------
# Wrapper
# --------------------------------------------------------------------------
def nt_xent(z1, z2, tau=0.5):
    assert z1.shape == z2.shape and z1.ndim == 2
    B, D = z1.shape
    N = 2 * B
    inv_sqrt_tau = 1.0 / math.sqrt(tau)

    # --- Kernel 1 ----------------------------------------------------------
    tile_b = _pick_batch_tile(B)
    zs, posdot = pl.pallas_call(
        functools.partial(_normalize_kernel,
                          inv_sqrt_tau=inv_sqrt_tau, eps_sq=1e-24),
        grid=(B // tile_b,),
        in_specs=[
            pl.BlockSpec((tile_b, D), lambda i: (i, 0)),
            pl.BlockSpec((tile_b, D), lambda i: (i, 0)),
        ],
        out_specs=[
            pl.BlockSpec((2, tile_b, D), lambda i: (0, i, 0)),
            pl.BlockSpec((tile_b, 1), lambda i: (i, 0)),
        ],
        out_shape=[
            jax.ShapeDtypeStruct((2, B, D), jnp.bfloat16),
            jax.ShapeDtypeStruct((B, 1), jnp.float32),
        ],
        compiler_params=pltpu.CompilerParams(
            dimension_semantics=("parallel",),
            vmem_limit_bytes=_VMEM_LIMIT),
    )(z1, z2)

    # Free contiguous reshape: rows [0:B] = z1s, rows [B:N] = z2s.
    z = zs.reshape(N, D)

    # --- Kernel 2 ----------------------------------------------------------
    tile_r = _pick_row_tile(N)
    tile_c = _pick_col_tile(N)
    acc_w = _LANE if tile_c % _LANE == 0 else tile_c

    log_neg = pl.pallas_call(
        functools.partial(_neg_kernel,
                          tile_r=tile_r, tile_c=tile_c, acc_w=acc_w),
        grid=(N // tile_r, N // tile_c),              # cols = reduction, last
        in_specs=[
            pl.BlockSpec((tile_r, D), lambda i, j: (i, 0)),
            pl.BlockSpec((tile_c, D), lambda i, j: (j, 0)),
        ],
        out_specs=pl.BlockSpec((tile_r, 1), lambda i, j: (i, 0)),
        out_shape=jax.ShapeDtypeStruct((N, 1), jnp.float32),
        scratch_shapes=[pltpu.VMEM((tile_r, acc_w), jnp.float32)],
        compiler_params=pltpu.CompilerParams(
            dimension_semantics=("parallel", "arbitrary"),
            vmem_limit_bytes=_VMEM_LIMIT),
    )(z, z)

    # loss = mean_r(-log(pos_r/neg_r)) = mean_r(log neg_r) - mean_b(s_pos_b/tau)
    return jnp.mean(log_neg) - jnp.mean(posdot)


def _nt_xent_ref(z1, z2, tau=0.5):
    # Pure-JAX f32 reference mirroring the PyTorch module.
    eps = 1e-12
    z1n = z1 / jnp.maximum(jnp.linalg.norm(z1, axis=-1, keepdims=True), eps)
    z2n = z2 / jnp.maximum(jnp.linalg.norm(z2, axis=-1, keepdims=True), eps)
    z = jnp.concatenate([z1n, z2n], axis=0)
    n = z.shape[0]
    sim = jnp.exp(z @ z.T / tau)
    neg = jnp.sum(jnp.where(~jnp.eye(n, dtype=bool), sim, 0.0), axis=-1)
    pos = jnp.exp(jnp.sum(z1n * z2n, axis=-1) / tau)
    pos = jnp.concatenate([pos, pos])
    return jnp.mean(-jnp.log(pos / neg))


if __name__ == "__main__":
    key = jax.random.PRNGKey(0)
    k1, k2 = jax.random.split(key)
    B, D = 8, 32
    z1 = jax.random.normal(k1, (B, D), dtype=jnp.float32)
    z2 = jax.random.normal(k2, (B, D), dtype=jnp.float32)

    loss = jax.block_until_ready(nt_xent(z1, z2, tau=0.5))
    ref = _nt_xent_ref(z1, z2, tau=0.5)
    # bf16 Gram matmul -> ~1e-3 absolute deviation in the loss is expected.
    assert jnp.allclose(loss, ref, rtol=1e-2, atol=2e-2), (loss, ref)
    print("KERNEL_OK")
</pallas_src>

<mosaic_0001>
module attributes {stable_mosaic.version = 11 : i64} {
  func.func @_normalize_kernel(%arg0: i32, %arg1: memref<8x32xf32, #tpu.memory_space<vmem>>, %arg2: memref<8x32xf32, #tpu.memory_space<vmem>>, %arg3: memref<2x8x32xbf16, #tpu.memory_space<vmem>>, %arg4: memref<8x1xf32, #tpu.memory_space<vmem>>) attributes {dimension_semantics = [#tpu.dimension_semantics<parallel>], iteration_bounds = array<i64: 1>, scalar_prefetch = 0 : i64, scratch_operands = 0 : i64, tpu.core_type = #tpu.core_type<tc>, window_params = [{transform_indices = @transform_0, window_bounds = array<i64: 8, 32>}, {transform_indices = @transform_1, window_bounds = array<i64: 8, 32>}, {transform_indices = @transform_2, window_bounds = array<i64: 2, 8, 32>}, {transform_indices = @transform_3, window_bounds = array<i64: 8, 1>}]} {
    %c0 = arith.constant 0 : index
    %c0_0 = arith.constant 0 : index
    %0 = vector.load %arg1[%c0, %c0_0] : memref<8x32xf32, #tpu.memory_space<vmem>>, vector<8x32xf32>
    %c0_1 = arith.constant 0 : index
    %c0_2 = arith.constant 0 : index
    %1 = vector.load %arg2[%c0_1, %c0_2] : memref<8x32xf32, #tpu.memory_space<vmem>>, vector<8x32xf32>
    %2 = arith.mulf %0, %0 : vector<8x32xf32>
    %cst = arith.constant dense<0.000000e+00> : vector<8xf32>
    %3 = vector.multi_reduction <add>, %2, %cst [1] : vector<8x32xf32> to vector<8xf32>
    %4 = vector.shape_cast %3 : vector<8xf32> to vector<8x1xf32>
    %cst_3 = arith.constant 1.000000e-24 : f32
    %5 = vector.broadcast %cst_3 : f32 to vector<8x1xf32>
    %6 = arith.maximumf %4, %5 : vector<8x1xf32>
    %7 = math.rsqrt %6 : vector<8x1xf32>
    %8 = arith.mulf %1, %1 : vector<8x32xf32>
    %cst_4 = arith.constant dense<0.000000e+00> : vector<8xf32>
    %9 = vector.multi_reduction <add>, %8, %cst_4 [1] : vector<8x32xf32> to vector<8xf32>
    %10 = vector.shape_cast %9 : vector<8xf32> to vector<8x1xf32>
    %cst_5 = arith.constant 1.000000e-24 : f32
    %11 = vector.broadcast %cst_5 : f32 to vector<8x1xf32>
    %12 = arith.maximumf %10, %11 : vector<8x1xf32>
    %13 = math.rsqrt %12 : vector<8x1xf32>
    %cst_6 = arith.constant 1.41421354 : f32
    %14 = vector.broadcast %cst_6 : f32 to vector<8x1xf32>
    %15 = arith.mulf %7, %14 : vector<8x1xf32>
    %16 = vector.broadcast %15 : vector<8x1xf32> to vector<8x32xf32>
    %17 = arith.mulf %0, %16 : vector<8x32xf32>
    %cst_7 = arith.constant 1.41421354 : f32
    %18 = vector.broadcast %cst_7 : f32 to vector<8x1xf32>
    %19 = arith.mulf %13, %18 : vector<8x1xf32>
    %20 = vector.broadcast %19 : vector<8x1xf32> to vector<8x32xf32>
    %21 = arith.mulf %1, %20 : vector<8x32xf32>
    %22 = arith.truncf %17 : vector<8x32xf32> to vector<8x32xbf16>
    %c0_8 = arith.constant 0 : index
    %c0_9 = arith.constant 0 : index
    %c0_10 = arith.constant 0 : index
    %23 = vector.load %arg3[%c0_8, %c0_9, %c0_10] : memref<2x8x32xbf16, #tpu.memory_space<vmem>>, vector<1x8x32xbf16>
    %24 = vector.shape_cast %23 : vector<1x8x32xbf16> to vector<8x32xbf16>
    %25 = vector.shape_cast %22 : vector<8x32xbf16> to vector<1x8x32xbf16>
    tpu.vector_store %arg3[%c0_8, %c0_9, %c0_10], %25 {strides = array<i32>} : memref<2x8x32xbf16, #tpu.memory_space<vmem>>, vector<1x8x32xbf16>,
    %26 = arith.truncf %21 : vector<8x32xf32> to vector<8x32xbf16>
    %c1 = arith.constant 1 : index
    %c0_11 = arith.constant 0 : index
    %c0_12 = arith.constant 0 : index
    %27 = vector.load %arg3[%c1, %c0_11, %c0_12] : memref<2x8x32xbf16, #tpu.memory_space<vmem>>, vector<1x8x32xbf16>
    %28 = vector.shape_cast %27 : vector<1x8x32xbf16> to vector<8x32xbf16>
    %29 = vector.shape_cast %26 : vector<8x32xbf16> to vector<1x8x32xbf16>
    tpu.vector_store %arg3[%c1, %c0_11, %c0_12], %29 {strides = array<i32>} : memref<2x8x32xbf16, #tpu.memory_space<vmem>>, vector<1x8x32xbf16>,
    %30 = arith.mulf %17, %21 : vector<8x32xf32>
    %cst_13 = arith.constant dense<0.000000e+00> : vector<8xf32>
    %31 = vector.multi_reduction <add>, %30, %cst_13 [1] : vector<8x32xf32> to vector<8xf32>
    %32 = vector.shape_cast %31 : vector<8xf32> to vector<8x1xf32>
    %c0_14 = arith.constant 0 : index
    %c0_15 = arith.constant 0 : index
    %33 = vector.load %arg4[%c0_14, %c0_15] : memref<8x1xf32, #tpu.memory_space<vmem>>, vector<8x1xf32>
    tpu.vector_store %arg4[%c0_14, %c0_15], %32 {strides = array<i32>} : memref<8x1xf32, #tpu.memory_space<vmem>>, vector<8x1xf32>,
    return
  }
  func.func @transform_0(%arg0: i32) -> (i32, i32) {
    %c0_i32 = arith.constant 0 : i32
    %c0_i32_0 = arith.constant 0 : i32
    return %arg0, %c0_i32 : i32, i32
  }
  func.func @transform_1(%arg0: i32) -> (i32, i32) {
    %c0_i32 = arith.constant 0 : i32
    %c0_i32_0 = arith.constant 0 : i32
    return %arg0, %c0_i32 : i32, i32
  }
  func.func @transform_2(%arg0: i32) -> (i32, i32, i32) {
    %c0_i32 = arith.constant 0 : i32
    %c0_i32_0 = arith.constant 0 : i32
    %c0_i32_1 = arith.constant 0 : i32
    return %c0_i32, %arg0, %c0_i32_0 : i32, i32, i32
  }
  func.func @transform_3(%arg0: i32) -> (i32, i32) {
    %c0_i32 = arith.constant 0 : i32
    %c0_i32_0 = arith.constant 0 : i32
    return %arg0, %c0_i32 : i32, i32
  }
}

</mosaic_0001>

<bundles_post_ra>
// kernel: tpu_custom_call.1
= control target key start
LH: loop header
LB: loop body
LE: loop exit
PB: predicated region body
PF: predicated region fallthrough
CT: control target
= control target key end

     0   :  { %9 = vsyncpa [#allocation3], 0  ;;  %s206_s0 = inlined_call_operand.hbm [shape: f32[8,32], index: 0, kind: input, shape index: {}]   ;;  %s207_s1 = inlined_call_operand.hbm [shape: f32[8,32], index: 1, kind: input, shape index: {}]   ;;  %s208_s2 = inlined_call_operand.hbm [shape: bf16[2,8,32], index: 2, kind: output, shape index: {0}]   ;;  %s209_s3 = inlined_call_operand.vmem [shape: f32[8,1], index: 3, kind: output, shape index: {1}]  }
   0x1   :  { %10 = vsyncpa [#allocation6], 0 }
   0x2   :  { %11 = vsyncpa [#allocation4], 0  ;;  %s166_s12 = smov [#allocation2]   ;;  %s167_s14 = smov [#allocation5]  }
   0x3   :  { %s18_s13 = sshll.u32 %s166_s12, 4  ;;  %s28_s15 = sshll.u32 %s167_s14, 4  ;;  %s19_s13 = int_to_ptr.vmem [resolvable:$true] %s18_s13  ;;  %s29_s15 = int_to_ptr.vmem [resolvable:$true] %s28_s15 }
   0x4   :  { %s108_s16 = scalar_lea.vmem %s19_s13, 128  ;;  %p113_p1 = scmp.lt.s32.totalorder %s19_s13, %s19_s13 }
   0x5   :  { %p109_p0 = scmp.ne.s32.totalorder %s19_s13, %s108_s16  ;;  %p114_p2 = scmp.lt.s32.totalorder %s108_s16, %s108_s16 }
   0x7   :  { %p115_p3 = por %p114_p2, %p113_p1 }
   0x9   :  { %p116_p4 = pnand %p115_p3, %p109_p0 }
   0xb   :  { %119 = shalt.err (!%p116_p4)
}
   0xc   :  { %21 = dma.hbm_to_vmem [thread:$0]  %s206_s0, 128, %s19_s13, [#allocation3]  }
   0xd   :  { %s128_s19 = scalar_lea.vmem %s29_s15, 128  ;;  %p133_p6 = scmp.lt.s32.totalorder %s29_s15, %s29_s15 }
   0xe   :  { %p129_p5 = scmp.ne.s32.totalorder %s29_s15, %s128_s19  ;;  %p134_p7 = scmp.lt.s32.totalorder %s128_s19, %s128_s19 }
  0x10   :  { %p135_p8 = por %p134_p7, %p133_p6 }
  0x12   :  { %p136_p9 = pnand %p135_p8, %p129_p5 }
  0x14   :  { %139 = shalt.err (!%p136_p9)
}
  0x15   :  { %31 = dma.hbm_to_vmem [thread:$0]  %s207_s1, 128, %s29_s15, [#allocation6]  }
  0x16   :  { %160 = dma.done.wait [#allocation3], 128  }
  0x17   :  { %161 = vsyncadd [#allocation3], 4294967168 }
  0x18   :  { %162 = dma.done.wait [#allocation6], 128  }
  0x19   :  { %163 = vsyncadd [#allocation6], 4294967168  ;;  %v38_v0 = vld [vmem:[#allocation2] sm:$0xff]  ;;  %vm41_vm0 = vcmask 261120   ;;  %v39_v1 = vld [vmem:[#allocation5] sm:$0xff]  ;;  %vm58_vm1 = vcmask 257024  }
  0x1a   :  { %v40_v2 = vmul.f32 %v38_v0, %v38_v0  ;;  %v47_v3 = vmul.f32 %v39_v1, %v39_v1  ;;  %s168_s0 = smov [#allocation7]  }
  0x1b   :  { %s74_s1 = sshll.u32 %s168_s0, 4  ;;  %s75_s1 = int_to_ptr.vmem [resolvable:$true] %s74_s1 }
  0x1c   :  { %v42_v4 = vsel %vm41_vm0, %v40_v2, 0.0  ;;  %v48_v5 = vsel %vm41_vm0, %v47_v3, 0.0  ;;  %s140_s22 = scalar_lea.vmem %s75_s1, 128  ;;  %p145_p11 = scmp.lt.s32.totalorder %s75_s1, %s75_s1 }
  0x1d   :  { %43 = vadd.xlane.f32.xlu0 %v42_v4  ;;  %p141_p10 = scmp.ne.s32.totalorder %s75_s1, %s140_s22  ;;  %p146_p12 = scmp.lt.s32.totalorder %s140_s22, %s140_s22 }
  0x1f   :  { %p147_p13 = por %p146_p12, %p145_p11 }
  0x21   :  { %49 = vadd.xlane.f32.xlu0 %v48_v5  ;;  %p148_p0 = pnand %p147_p13, %p141_p10 }
  0xa6   :  { %v44_v6 = vpop.xlane.xlu0 %43 }
  0xa7   :  { %v45_v7 = vmax.f32 %v44_v6, 1e-24 }
  0xa9   :  { %96 = vrsqrt.f32 %v45_v7 }
  0xaa   :  { %v50_v8 = vpop.xlane.xlu0 %49 }
  0xab   :  { %v51_v9 = vmax.f32 %v50_v8, 1e-24 }
  0xad   :  { %98 = vrsqrt.f32 %v51_v9 }
  0xb6   :  { %v97_v10 = vpop.eup %96 }
  0xb7   :  { %v53_v11 = vmul.f32 1.4142135, %v97_v10 }
  0xb9   :  { %v54_v12 = vmul.f32 %v53_v11, %v38_v0 }
  0xba   :  { %v99_v13 = vpop.eup %98 }
  0xbb   :  { %v55_v14 = vmul.f32 1.4142135, %v99_v13  ;;  %v57_v15 = vpack.c.bf16 %v54_v12, %v54_v12 }
  0xbd   :  { %v56_v16 = vmul.f32 %v55_v14, %v39_v1  ;;  %59 = vst.msk [vmem:[#allocation7] sm:$0xf] %vm58_vm1, %v57_v15 }
  0xbf   :  { %v63_v17 = vmul.f32 %v56_v16, %v54_v12  ;;  %v60_v18 = vpack.c.bf16 %v56_v16, %v56_v16 }
  0xc1   :  { %v64_v19 = vsel %vm41_vm0, %v63_v17, 0.0  ;;  %62 = vst.msk [vmem:[#allocation7 + $0x4] sm:$0xf] %vm58_vm1, %v60_v18 }
  0xc2   :  { %65 = vadd.xlane.f32.xlu1 %v64_v19 }
  0xc3   :  { %151 = shalt.err (!%p148_p0)
}
  0xc4   :  { %s169_s23 = smov 64   ;;  %s170_s24 = smov 4   ;;  %vm67_vm2 = vcmask 7168  }
  0xc5   :  { %80 = dma.vmem_to_hbm [thread:$0]  %s75_s1, 128, %s208_s2, [#allocation4], %s169_s23, %s169_s23, %s170_s24  }
 0x14b   :  { %v66_v20 = vpop.xlane.xlu1 %65 }
 0x14c   :  { %68 = vst.msk [vmem:[%s209_s3] sm:$0xff] %vm67_vm2, %v66_v20 }
 0x14d   :  { %164 = dma.done.wait [#allocation4], 128  }
 0x14e   :  { %165 = vsyncadd [#allocation4], 4294967168 }
 0x14f   :  { %88 = vsyncpa [#allocation3], 1 }
 0x150   :  { %89 = vsyncpa [#allocation6], 1 }
 0x151   :  { %90 = vsyncpa [#allocation4], 1 }

</bundles_post_ra>
